<compile_context>
chip_gen: v6e
topology: v6e:2x2x1
jax: 0.10.0
libtpu: 0.0.40
codegen_flags: <defaults>
</compile_context>

<pallas_src>
import jax
import jax.numpy as jnp
from jax.experimental import pallas as pl
from jax.experimental.pallas import tpu as pltpu


def _upsample_kernel(x_ref, w_ref, b_ref, o_ref):
    # x_ref: (1, HT*W, Cin)         row-chunk of one image, channels-last
    # w_ref: (Cin, 2*Cout)          BN-scale-folded conv weights, duplicated along Cout
    # b_ref: (1, 2*Cout)            folded BN bias, duplicated along Cout
    # o_ref: (1, HT, 2, W, 2*Cout)  contiguous view of (1, 2*HT, 2*W, Cout)
    ht = o_ref.shape[1]
    w = o_ref.shape[3]
    cd = o_ref.shape[4]

    x = x_ref[0]                                                      # (HT*W, Cin)

    # 1x1 conv (+ folded BN scale + width duplication) as one MXU matmul
    y = jnp.dot(x, w_ref[...], preferred_element_type=jnp.float32)    # (HT*W, 2*Cout)
    y = y + b_ref[...]                                                # folded BN bias
    y = jnp.where(y > 0, y, 0.1 * y)                                  # LeakyReLU(0.1)

    # split rows back out; W % 8 == 0 (or HT == H) keeps this a layout no-op
    y = y.reshape(ht, w, cd).astype(o_ref.dtype)

    # nearest 2x along H: write the same tile to both duplicated output rows
    o_ref[0, :, 0, :, :] = y
    o_ref[0, :, 1, :, :] = y


def _pick_block_rows(H, W, Cin, Cout, itemsize=4, budget_bytes=6 * 1024 * 1024):
    """Rows of the input image processed per grid step.

    Sized so (input block + 4x larger output block), double-buffered, stays well
    under the scoped VMEM limit on all generations (incl. v7x's 64 MiB physical).
    """
    per_row = 2 * (W * Cin + 4 * W * Cout) * itemsize
    ht = max(1, min(H, budget_bytes // max(per_row, 1)))
    # shrink to a divisor of H whose block satisfies the (8, 128) layout rule
    while ht > 1 and (H % ht != 0 or (ht * W) % 8 != 0):
        ht -= 1
    if H % ht != 0 or ((ht * W) % 8 != 0 and ht != H):
        ht = H  # fall back to whole-image blocks (always layout-legal)
    return ht


def upsample_forward_nhwc(x_nhwc, w, gamma, beta, running_mean, running_var, eps=1e-5):
    """x_nhwc: (N, H, W, Cin) float32.  Returns (N, 2H, 2W, Cout) float32."""
    N, H, W, Cin = x_nhwc.shape
    Cout = w.shape[0]

    # Fold BatchNorm (eval semantics) into the conv weights / a bias vector.
    scale = gamma / jnp.sqrt(running_var + eps)                     # (Cout,)
    bias = beta - running_mean * scale                              # (Cout,)
    w_mat = jnp.transpose(w.reshape(Cout, Cin), (1, 0)) * scale[None, :]   # (Cin, Cout)

    # Duplicate along the output-channel axis -> the matmul emits each output pixel
    # twice, which is exactly the nearest-2x width upsample in the contiguous
    # (..., W, 2, Cout) view of the output.
    w_dup = jnp.concatenate([w_mat, w_mat], axis=1).astype(jnp.float32)     # (Cin, 2*Cout)
    b_dup = jnp.concatenate([bias, bias]).reshape(1, 2 * Cout).astype(jnp.float32)

    HT = _pick_block_rows(H, W, Cin, Cout)
    grid = (N, H // HT)

    x_flat = x_nhwc.astype(jnp.float32).reshape(N, H * W, Cin)      # free contiguous reshape

    out_view = pl.pallas_call(
        _upsample_kernel,
        out_shape=jax.ShapeDtypeStruct((N, H, 2, W, 2 * Cout), jnp.float32),
        grid_spec=pltpu.PrefetchScalarGridSpec(
            num_scalar_prefetch=0,
            grid=grid,
            in_specs=[
                pl.BlockSpec((1, HT * W, Cin), lambda n, r: (n, r, 0)),
                pl.BlockSpec((Cin, 2 * Cout), lambda n, r: (0, 0)),
                pl.BlockSpec((1, 2 * Cout), lambda n, r: (0, 0)),
            ],
            out_specs=pl.BlockSpec(
                (1, HT, 2, W, 2 * Cout), lambda n, r: (n, r, 0, 0, 0)
            ),
        ),
        compiler_params=pltpu.CompilerParams(
            dimension_semantics=("parallel", "parallel"),
            vmem_limit_bytes=32 * 1024 * 1024,
        ),
    )(x_flat, w_dup, b_dup)

    # (N, H, 2, W, 2*Cout) is a contiguous view of (N, 2H, 2W, Cout): free reshape.
    return out_view.reshape(N, 2 * H, 2 * W, Cout)


def upsample_forward(x_nchw, w, gamma, beta, running_mean, running_var, eps=1e-5):
    """PyTorch-convention adapter: (N, Cin, H, W) -> (N, Cout, 2H, 2W).

    Note: if the surrounding model keeps NHWC activations, call
    `upsample_forward_nhwc` directly and these two transposes disappear.
    """
    x_nhwc = jnp.transpose(x_nchw, (0, 2, 3, 1))
    out_nhwc = upsample_forward_nhwc(x_nhwc, w, gamma, beta, running_mean, running_var, eps)
    return jnp.transpose(out_nhwc, (0, 3, 1, 2))


def upsample_reference(x_nchw, w, gamma, beta, running_mean, running_var, eps=1e-5):
    """Pure-JAX reference (NCHW) for correctness checking."""
    N, Cin, H, W = x_nchw.shape
    Cout = w.shape[0]
    w_mat = w.reshape(Cout, Cin)
    y = jnp.einsum("nchw,oc->nohw", x_nchw, w_mat)                  # 1x1 conv
    scale = (gamma / jnp.sqrt(running_var + eps)).reshape(1, Cout, 1, 1)
    bias = (beta - running_mean * gamma / jnp.sqrt(running_var + eps)).reshape(1, Cout, 1, 1)
    y = y * scale + bias
    y = jnp.where(y > 0, y, 0.1 * y)
    y = jnp.repeat(jnp.repeat(y, 2, axis=2), 2, axis=3)             # nearest 2x
    return y


if __name__ == "__main__":
    key = jax.random.PRNGKey(0)
    k1, k2, k3, k4, k5, k6 = jax.random.split(key, 6)

    N, Cin, H, W = 2, 16, 16, 16
    Cout = 8

    x = jax.random.normal(k1, (N, Cin, H, W), dtype=jnp.float32)
    conv_w = jax.random.normal(k2, (Cout, Cin, 1, 1), dtype=jnp.float32) * 0.1
    gamma = 1.0 + 0.1 * jax.random.normal(k3, (Cout,), dtype=jnp.float32)
    beta = 0.1 * jax.random.normal(k4, (Cout,), dtype=jnp.float32)
    running_mean = 0.1 * jax.random.normal(k5, (Cout,), dtype=jnp.float32)
    running_var = jnp.abs(jax.random.normal(k6, (Cout,), dtype=jnp.float32)) + 0.5

    ref = upsample_reference(x, conv_w, gamma, beta, running_mean, running_var)

    # NHWC primary path (no layout transposes around the kernel)
    x_nhwc = jnp.transpose(x, (0, 2, 3, 1))
    out_nhwc = upsample_forward_nhwc(x_nhwc, conv_w, gamma, beta, running_mean, running_var)
    out_nhwc = jax.block_until_ready(out_nhwc)
    assert out_nhwc.shape == (N, 2 * H, 2 * W, Cout), out_nhwc.shape
    ref_nhwc = jnp.transpose(ref, (0, 2, 3, 1))
    assert jnp.allclose(out_nhwc, ref_nhwc, atol=1e-5, rtol=1e-5), "NHWC mismatch vs reference"

    # NCHW adapter (PyTorch convention)
    out = upsample_forward(x, conv_w, gamma, beta, running_mean, running_var)
    out = jax.block_until_ready(out)
    assert out.shape == (N, Cout, 2 * H, 2 * W), out.shape
    assert jnp.allclose(out, ref, atol=1e-5, rtol=1e-5), "NCHW mismatch vs reference"

    print("KERNEL_OK")
</pallas_src>

<mosaic_0001>
module attributes {stable_mosaic.version = 11 : i64} {
  func.func @_upsample_kernel(%arg0: i32, %arg1: i32, %arg2: memref<1x256x16xf32, #tpu.memory_space<vmem>>, %arg3: memref<16x16xf32, #tpu.memory_space<vmem>>, %arg4: memref<1x16xf32, #tpu.memory_space<vmem>>, %arg5: memref<1x16x2x16x16xf32, #tpu.memory_space<vmem>>) attributes {dimension_semantics = [#tpu.dimension_semantics<parallel>, #tpu.dimension_semantics<parallel>], iteration_bounds = array<i64: 2, 1>, scalar_prefetch = 0 : i64, scratch_operands = 0 : i64, tpu.core_type = #tpu.core_type<tc>, window_params = [{transform_indices = @transform_0, window_bounds = array<i64: 1, 256, 16>}, {pipeline_mode = #tpu.pipeline_mode<synchronous>, transform_indices = @transform_1, window_bounds = array<i64: 16, 16>}, {pipeline_mode = #tpu.pipeline_mode<synchronous>, transform_indices = @transform_2, window_bounds = array<i64: 1, 16>}, {transform_indices = @transform_3, window_bounds = array<i64: 1, 16, 2, 16, 16>}]} {
    %c0 = arith.constant 0 : index
    %c0_0 = arith.constant 0 : index
    %c0_1 = arith.constant 0 : index
    %0 = vector.load %arg2[%c0, %c0_0, %c0_1] : memref<1x256x16xf32, #tpu.memory_space<vmem>>, vector<1x256x16xf32>
    %1 = vector.shape_cast %0 : vector<1x256x16xf32> to vector<256x16xf32>
    %c0_2 = arith.constant 0 : index
    %c0_3 = arith.constant 0 : index
    %2 = vector.load %arg3[%c0_2, %c0_3] : memref<16x16xf32, #tpu.memory_space<vmem>>, vector<16x16xf32>
    %cst = arith.constant dense<0.000000e+00> : vector<256x16xf32>
    %3 = tpu.matmul %1, %2, %cst {dimension_numbers = #tpu.dot_dimension_numbers<[1], [0], [0], [1], [0, 0, 1, 1], [], []>} : vector<256x16xf32>, vector<16x16xf32>, vector<256x16xf32> -> vector<256x16xf32>
    %c0_4 = arith.constant 0 : index
    %c0_5 = arith.constant 0 : index
    %4 = vector.load %arg4[%c0_4, %c0_5] : memref<1x16xf32, #tpu.memory_space<vmem>>, vector<1x16xf32>
    %5 = vector.broadcast %4 : vector<1x16xf32> to vector<256x16xf32>
    %6 = arith.addf %3, %5 : vector<256x16xf32>
    %cst_6 = arith.constant 0.000000e+00 : f32
    %7 = vector.broadcast %cst_6 : f32 to vector<256x16xf32>
    %8 = arith.cmpf ogt, %6, %7 : vector<256x16xf32>
    %cst_7 = arith.constant 1.000000e-01 : f32
    %9 = vector.broadcast %cst_7 : f32 to vector<256x16xf32>
    %10 = arith.mulf %9, %6 : vector<256x16xf32>
    %11 = arith.select %8, %6, %10 : vector<256x16xi1>, vector<256x16xf32>
    %12 = vector.shape_cast %11 : vector<256x16xf32> to vector<16x16x16xf32>
    %c0_8 = arith.constant 0 : index
    %c0_9 = arith.constant 0 : index
    %c0_10 = arith.constant 0 : index
    %c0_11 = arith.constant 0 : index
    %c0_12 = arith.constant 0 : index
    %13 = vector.load %arg5[%c0_8, %c0_9, %c0_10, %c0_11, %c0_12] : memref<1x16x2x16x16xf32, #tpu.memory_space<vmem>>, vector<1x16x1x16x16xf32>
    %14 = vector.shape_cast %13 : vector<1x16x1x16x16xf32> to vector<16x16x16xf32>
    %15 = vector.shape_cast %12 : vector<16x16x16xf32> to vector<1x16x1x16x16xf32>
    tpu.vector_store %arg5[%c0_8, %c0_9, %c0_10, %c0_11, %c0_12], %15 {strides = array<i32>} : memref<1x16x2x16x16xf32, #tpu.memory_space<vmem>>, vector<1x16x1x16x16xf32>,
    %c0_13 = arith.constant 0 : index
    %c0_14 = arith.constant 0 : index
    %c1 = arith.constant 1 : index
    %c0_15 = arith.constant 0 : index
    %c0_16 = arith.constant 0 : index
    %16 = vector.load %arg5[%c0_13, %c0_14, %c1, %c0_15, %c0_16] : memref<1x16x2x16x16xf32, #tpu.memory_space<vmem>>, vector<1x16x1x16x16xf32>
    %17 = vector.shape_cast %16 : vector<1x16x1x16x16xf32> to vector<16x16x16xf32>
    %18 = vector.shape_cast %12 : vector<16x16x16xf32> to vector<1x16x1x16x16xf32>
    tpu.vector_store %arg5[%c0_13, %c0_14, %c1, %c0_15, %c0_16], %18 {strides = array<i32>} : memref<1x16x2x16x16xf32, #tpu.memory_space<vmem>>, vector<1x16x1x16x16xf32>,
    return
  }
  func.func @transform_0(%arg0: i32, %arg1: i32) -> (i32, i32, i32) {
    %c0_i32 = arith.constant 0 : i32
    %c0_i32_0 = arith.constant 0 : i32
    return %arg0, %arg1, %c0_i32 : i32, i32, i32
  }
  func.func @transform_1(%arg0: i32, %arg1: i32) -> (i32, i32) {
    %c0_i32 = arith.constant 0 : i32
    %c0_i32_0 = arith.constant 0 : i32
    %c0_i32_1 = arith.constant 0 : i32
    return %c0_i32, %c0_i32_0 : i32, i32
  }
  func.func @transform_2(%arg0: i32, %arg1: i32) -> (i32, i32) {
    %c0_i32 = arith.constant 0 : i32
    %c0_i32_0 = arith.constant 0 : i32
    %c0_i32_1 = arith.constant 0 : i32
    return %c0_i32, %c0_i32_0 : i32, i32
  }
  func.func @transform_3(%arg0: i32, %arg1: i32) -> (i32, i32, i32, i32, i32) {
    %c0_i32 = arith.constant 0 : i32
    %c0_i32_0 = arith.constant 0 : i32
    %c0_i32_1 = arith.constant 0 : i32
    %c0_i32_2 = arith.constant 0 : i32
    return %arg0, %arg1, %c0_i32, %c0_i32_0, %c0_i32_1 : i32, i32, i32, i32, i32
  }
}

</mosaic_0001>

<bundles_post_ra>
// kernel: tpu_custom_call.1
= control target key start
LH: loop header
LB: loop body
LE: loop exit
PB: predicated region body
PF: predicated region fallthrough
CT: control target
= control target key end

     0   :  { %8 = vsyncpa [#allocation3], 0  ;;  %s1510_s0 = inlined_call_operand.vmem [shape: f32[2,256,16], index: 0, kind: input, shape index: {}]   ;;  %s1511_s1 = inlined_call_operand.vmem [shape: f32[16,16], index: 1, kind: input, shape index: {}]   ;;  %s1512_s2 = inlined_call_operand.vmem [shape: f32[1,16], index: 2, kind: input, shape index: {}]   ;;  %s1513_s3 = inlined_call_operand.hbm [shape: f32[2,16,2,16,16], index: 3, kind: output, shape index: {}]  }
   0x1   :  { %10 = vsyncpa [#allocation3 + $0x1], 0  ;;  %s1148_s12 = smov 0   ;;  %s1150_s13 = smov 0  }
   0x2   :  { %s1152_s14 = smov 0   ;;  %s1154_s15 = smov 0  }
   0x3   :  { %s1156_s16 = smov 0   ;;  %s1158_s17 = smov 0  }
   0x4 LB: > { %s820_s18 = sadd.s32 4294967295, %s1123_s17   ;;  %s821_s19 = sadd.s32 4294967294, %s1123_s17   ;;  %s1123_s17 = sphi %s1158_s17, %s16_s17   ;;  %s1119_s16 = sphi %s1156_s16, %s1520_s16   ;;  %s1115_s15 = sphi %s1154_s15, %s1519_s15   ;;  %s1111_s14 = sphi %s1152_s14, %s1518_s14   ;;  %s1107_s13 = sphi %s1150_s13, %s1517_s13   ;;  %s1103_s12 = sphi %s1148_s12, %s1516_s12  }
   0x5   : > { %s28_s20 = sadd.s32 1, %s1119_s16  ;;  %s107_s21 = sadd.s32 1, %s1111_s14 }
   0x6   : > { %p30_p0 = scmp.ge.s32.totalorder %s28_s20, 2  ;;  %p117_p1 = scmp.ne.s32.totalorder %s1111_s14, %s1107_s13 }
   0x7   : > { %p118_p2 = scmp.eq.s32.totalorder %s820_s18, 1  ;;  %p123_p3 = scmp.ne.s32.totalorder %s1107_s13, %s1103_s12 }
   0x8   : > { %s1522_s20 = smov (%p30_p0, %s28_s20), 0  ;;  %p124_p5 = scmp.eq.s32.totalorder %s821_s19, 1 }
   0x9   : > { %p1188_p4 = por %p118_p2, %p117_p1  ;;  %s102_s23 = ssub.s32 %s1119_s16, %s1522_s20 }
   0xa   : > { %p824_p6 = scmp.ge.s32.totalorder %s1123_s17, 1  ;;  %p105_p7 = scmp.eq.s32.totalorder %s102_s23, 0 }
   0xb   : > { %p1195_p8 = por %p124_p5, %p123_p3  ;;  %p161_p9 = scmp.lt.s32.totalorder %s1123_s17, 3 }
   0xc   : > { %s1201_s25 = scalar_select %p105_p7, %s1111_s14, %s107_s21  }
   0xd   : > { %p162_p10 = pnand %p824_p6, %p161_p9 }
   0xe   : > { %p190_p11 = scmp.lt.s32.totalorder (!%p162_p10), %s1115_s15, 1  ;;  %s186_s8 = sand.u32 (!%p162_p10), 1, %s1107_s13  }
   0xf   : > { %165 = sbr.rel (%p162_p10) target bundleno = 269 (0x10d), region = 32  ;;  %s825_s11 = sshll.u32 (!%p162_p10), %s186_s8, 9 }
  0x10   : > { %s1294_s18 = scalar_lea.vmem (!%p162_p10), [#allocation2], %s825_s11  ;;  %s899_s19 = sshll.u32 (!%p162_p10), %s1115_s15, 13 }
  0x11   : > { %s741_s21 = sshll.u32 (!%p162_p10), %s1294_s18, 4  ;;  %s1449_s27 = scalar_lea.hbm (!%p162_p10), %s1513_s3, %s899_s19  ;;  %s1453_s21 = int_to_ptr.vmem [resolvable:$true] %s741_s21 }
  0x12   : > { %s1047_s28 = scalar_lea.vmem (!%p162_p10), %s1453_s21, 8192  ;;  %s1125_s29 = smov (!%p162_p10), [#allocation2]  }
  0x13   : > { %p1048_p12 = scmp.ne.s32.totalorder (!%p162_p10), %s1453_s21, %s1047_s28 }
  0x14   : > { %v233_v0 = vld [vmem:[%s1511_s1 + $0x8] sm:$0xff]  ;;  %v232_v1 = vld [vmem:[%s1511_s1] sm:$0xff]  ;;  %s191_s30 = scalar_select %p190_p11, %s1115_s15, 1  ;;  %vm241_vm0 = vcmask 130048  }
  0x15   : > { %934 = vmatprep.subr.mxu0 %v233_v0  ;;  %986 = vmatprep.subr.mxu1 %v233_v0  ;;  %v1284_v34 = vld [vmem:[%s1512_s2] ss:$0 sm:$0xff]  ;;  %s1465_s15 = scalar_lea.sflag [#allocation3], %s186_s8  ;;  %p1049_p13 = pnand %p1048_p12, %p1188_p4 }
  0x16   : > { %935 = vmatpush3.msra.mxu0 %v233_v0  ;;  %988 = vmatpush3.msra.mxu1 %v233_v0  ;;  %s898_s4 = sshll.u32 %s191_s30, 8  ;;  %s1051_s30 = sshll.u32 %s1125_s29, 4  ;;  %s1052_s30 = int_to_ptr.vmem [resolvable:$false] %s1051_s30 }
  0x17   : > { %936 = vmatprep.subr.mxu0 %v232_v1  ;;  %987 = vmatprep.subr.mxu1 %v232_v1  ;;  %s1214_s7 = scalar_lea.vmem %s1510_s0, %s898_s4  ;;  %p1050_p0 = pneg %p1049_p13 }
  0x18   : > { %937 = vmatpush3.msra.mxu0 %v232_v1  ;;  %989 = vmatpush3.msra.mxu1 %v232_v1  ;;  %v200_v2 = vld [vmem:[%s1214_s7] sm:$0xff]  ;;  %v201_v4 = vld [vmem:[%s1214_s7 + $0x8] sm:$0xff]  ;;  %v202_v6 = vld [vmem:[%s1214_s7 + $0x10] sm:$0xff]  ;;  %s1053_s4 = scalar_lea.vmem %s1052_s30, 16384  ;;  %p1054_p1 = scmp.lt.s32.totalorder %s1453_s21, %s1052_s30 }
  0x19   : > { %v216_v3 = vld [vmem:[%s1214_s7 + $0x80] sm:$0xff]  ;;  %938 = vmatprep.mubr.msk.f32.mxu0 %vm241_vm0, %v200_v2  ;;  %v217_v5 = vld [vmem:[%s1214_s7 + $0x88] sm:$0xff]  ;;  %v218_v7 = vld [vmem:[%s1214_s7 + $0x90] sm:$0xff]  ;;  %p1055_p2 = scmp.lt.s32.totalorder %s1053_s4, %s1047_s28 }
  0x1a   : > { %962 = vmatprep.mubr.msk.f32.mxu1 %vm241_vm0, %v216_v3  ;;  %939 = vmatmul.mubr.msk.f32.vlgmr.msra.gmra.mxu0 %vm241_vm0, %v201_v4  ;;  %v203_v8 = vld [vmem:[%s1214_s7 + $0x18] sm:$0xff]  ;;  %v204_v10 = vld [vmem:[%s1214_s7 + $0x20] sm:$0xff]  ;;  %v205_v12 = vld [vmem:[%s1214_s7 + $0x28] sm:$0xff] }
  0x1b   : > { %963 = vmatmul.mubr.msk.f32.vlgmr.msra.gmra.mxu1 %vm241_vm0, %v217_v5  ;;  %941 = vmatprep.mubr.msk.f32.mxu0 %vm241_vm0, %v202_v6  ;;  %v219_v9 = vld [vmem:[%s1214_s7 + $0x98] sm:$0xff]  ;;  %v220_v11 = vld [vmem:[%s1214_s7 + $0xa0] sm:$0xff]  ;;  %v221_v13 = vld [vmem:[%s1214_s7 + $0xa8] sm:$0xff]  ;;  %p1056_p3 = por %p1055_p2, %p1054_p1 }
  0x1c   : > { %965 = vmatprep.mubr.msk.f32.mxu1 %vm241_vm0, %v218_v7  ;;  %v206_v14 = vld [vmem:[%s1214_s7 + $0x30] sm:$0xff]  ;;  %v207_v16 = vld [vmem:[%s1214_s7 + $0x38] sm:$0xff]  ;;  %v208_v18 = vld [vmem:[%s1214_s7 + $0x40] sm:$0xff] }
  0x1d   : > { %v222_v15 = vld [vmem:[%s1214_s7 + $0xb0] sm:$0xff]  ;;  %v223_v17 = vld [vmem:[%s1214_s7 + $0xb8] sm:$0xff]  ;;  %v224_v19 = vld [vmem:[%s1214_s7 + $0xc0] sm:$0xff]  ;;  %p1057_p5 = pnand %p1056_p3, %p1050_p0 }
  0x1e   : > { %942 = vmatmul.mubr.msk.f32.gmra.mxu0 %vm241_vm0, %v203_v8  ;;  %v209_v20 = vld [vmem:[%s1214_s7 + $0x48] sm:$0xff]  ;;  %v210_v22 = vld [vmem:[%s1214_s7 + $0x50] sm:$0xff]  ;;  %v211_v24 = vld [vmem:[%s1214_s7 + $0x58] sm:$0xff] }
  0x1f   : > { %966 = vmatmul.mubr.msk.f32.gmra.mxu1 %vm241_vm0, %v219_v9  ;;  %944 = vmatprep.mubr.msk.f32.mxu0 %vm241_vm0, %v204_v10  ;;  %v225_v21 = vld [vmem:[%s1214_s7 + $0xc8] sm:$0xff]  ;;  %v226_v23 = vld [vmem:[%s1214_s7 + $0xd0] sm:$0xff]  ;;  %v227_v25 = vld [vmem:[%s1214_s7 + $0xd8] sm:$0xff] }
  0x20   : > { %968 = vmatprep.mubr.msk.f32.mxu1 %vm241_vm0, %v220_v11  ;;  %v212_v26 = vld [vmem:[%s1214_s7 + $0x60] sm:$0xff]  ;;  %v213_v28 = vld [vmem:[%s1214_s7 + $0x68] sm:$0xff]  ;;  %v214_v30 = vld [vmem:[%s1214_s7 + $0x70] sm:$0xff] }
  0x21   : > { %v228_v27 = vld [vmem:[%s1214_s7 + $0xe0] sm:$0xff]  ;;  %v229_v29 = vld [vmem:[%s1214_s7 + $0xe8] sm:$0xff]  ;;  %v230_v31 = vld [vmem:[%s1214_s7 + $0xf0] sm:$0xff] }
  0x22   : > { %945 = vmatmul.mubr.msk.f32.gmra.mxu0 %vm241_vm0, %v205_v12  ;;  %v215_v32 = vld [vmem:[%s1214_s7 + $0x78] sm:$0xff] }
  0x23   : > { %969 = vmatmul.mubr.msk.f32.gmra.mxu1 %vm241_vm0, %v221_v13  ;;  %947 = vmatprep.mubr.msk.f32.mxu0 %vm241_vm0, %v206_v14  ;;  %v231_v33 = vld [vmem:[%s1214_s7 + $0xf8] sm:$0xff] }
  0x24   : > { %971 = vmatprep.mubr.msk.f32.mxu1 %vm241_vm0, %v222_v15 }
  0x26   : > { %948 = vmatmul.mubr.msk.f32.gmra.mxu0 %vm241_vm0, %v207_v16 }
  0x27   : > { %972 = vmatmul.mubr.msk.f32.gmra.mxu1 %vm241_vm0, %v223_v17  ;;  %950 = vmatprep.mubr.msk.f32.mxu0 %vm241_vm0, %v208_v18 }
  0x28   : > { %974 = vmatprep.mubr.msk.f32.mxu1 %vm241_vm0, %v224_v19 }
  0x2a   : > { %951 = vmatmul.mubr.msk.f32.gmra.mxu0 %vm241_vm0, %v209_v20 }
  0x2b   : > { %975 = vmatmul.mubr.msk.f32.gmra.mxu1 %vm241_vm0, %v225_v21  ;;  %953 = vmatprep.mubr.msk.f32.mxu0 %vm241_vm0, %v210_v22 }
  0x2c   : > { %977 = vmatprep.mubr.msk.f32.mxu1 %vm241_vm0, %v226_v23 }
  0x2e   : > { %954 = vmatmul.mubr.msk.f32.gmra.mxu0 %vm241_vm0, %v211_v24 }
  0x2f   : > { %978 = vmatmul.mubr.msk.f32.gmra.mxu1 %vm241_vm0, %v227_v25  ;;  %956 = vmatprep.mubr.msk.f32.mxu0 %vm241_vm0, %v212_v26 }
  0x30   : > { %980 = vmatprep.mubr.msk.f32.mxu1 %vm241_vm0, %v228_v27 }
  0x32   : > { %957 = vmatmul.mubr.msk.f32.gmra.mxu0 %vm241_vm0, %v213_v28 }
  0x33   : > { %981 = vmatmul.mubr.msk.f32.gmra.mxu1 %vm241_vm0, %v229_v29  ;;  %959 = vmatprep.mubr.msk.f32.mxu0 %vm241_vm0, %v214_v30 }
  0x34   : > { %983 = vmatprep.mubr.msk.f32.mxu1 %vm241_vm0, %v230_v31 }
  0x36   : > { %960 = vmatmul.mubr.msk.f32.gmra.mxu0 %vm241_vm0, %v215_v32 }
  0x37   : > { %984 = vmatmul.mubr.msk.f32.gmra.mxu1 %vm241_vm0, %v231_v33 }
  0xda   : > { %v940_v35 = vpop.f32.mrf.mxu0 }
  0xdb   : > { %v964_v36 = vpop.f32.mrf.mxu1  ;;  %v410_v37 = vadd.f32 %v940_v35, %v1284_v34 }
  0xdc   : > { %v490_v38 = vadd.f32 %v964_v36, %v1284_v34  ;;  %v404_v39 = vpop.f32.mrf.mxu0 }
  0xdd   : > { %v484_v40 = vpop.f32.mrf.mxu1  ;;  %vm564_vm1 = vcmp.gt.f32.partialorder %v410_v37, 0.0  ;;  %v596_v41 = vmul.f32 0.1, %v410_v37  ;;  %v405_v43 = vadd.f32 %v1284_v34, %v404_v39 }
  0xde   : > { %vm580_vm2 = vcmp.gt.f32.partialorder %v490_v38, 0.0  ;;  %v612_v42 = vmul.f32 0.1, %v490_v38  ;;  %v485_v44 = vadd.f32 %v1284_v34, %v484_v40  ;;  %v943_v45 = vpop.f32.mrf.mxu0 }
  0xdf   : > { %v967_v46 = vpop.f32.mrf.mxu1  ;;  %v628_v47 = vsel %vm564_vm1, %v410_v37, %v596_v41  ;;  %v420_v49 = vadd.f32 %v943_v45, %v1284_v34  ;;  %vm563_vm3 = vcmp.gt.f32.partialorder %v405_v43, 0.0  ;;  %v595_v51 = vmul.f32 0.1, %v405_v43 }
  0xe0   : > { %v644_v48 = vsel %vm580_vm2, %v490_v38, %v612_v42  ;;  %v500_v50 = vadd.f32 %v967_v46, %v1284_v34  ;;  %660 = vst.msk [vmem:[%s1294_s18 + $0x8] sm:$0xff] %vm241_vm0, %v628_v47  ;;  %862 = vst.msk [vmem:[%s1294_s18 + $0x18] sm:$0xff] %vm241_vm0, %v628_v47  ;;  %vm579_vm4 = vcmp.gt.f32.partialorder %v485_v44, 0.0  ;;  %v611_v52 = vmul.f32 0.1, %v485_v44  ;;  %v414_v53 = vpop.f32.mrf.mxu0 }
  0xe1   : > { %676 = vst.msk [vmem:[%s1294_s18 + $0x108] sm:$0xff] %vm241_vm0, %v644_v48  ;;  %878 = vst.msk [vmem:[%s1294_s18 + $0x118] sm:$0xff] %vm241_vm0, %v644_v48  ;;  %v494_v54 = vpop.f32.mrf.mxu1  ;;  %vm566_vm5 = vcmp.gt.f32.partialorder %v420_v49, 0.0  ;;  %v598_v55 = vmul.f32 0.1, %v420_v49  ;;  %v627_v57 = vsel %vm563_vm3, %v405_v43, %v595_v51  ;;  %v415_v59 = vadd.f32 %v1284_v34, %v414_v53 }
  0xe2   : > { %vm582_vm6 = vcmp.gt.f32.partialorder %v500_v50, 0.0  ;;  %v614_v56 = vmul.f32 0.1, %v500_v50  ;;  %v643_v58 = vsel %vm579_vm4, %v485_v44, %v611_v52  ;;  %v495_v60 = vadd.f32 %v1284_v34, %v494_v54  ;;  %v946_v61 = vpop.f32.mrf.mxu0  ;;  %659 = vst.msk [vmem:[%s1294_s18] sm:$0xff] %vm241_vm0, %v627_v57  ;;  %861 = vst.msk [vmem:[%s1294_s18 + $0x10] sm:$0xff] %vm241_vm0, %v627_v57 }
  0xe3   : > { %v970_v62 = vpop.f32.mrf.mxu1  ;;  %675 = vst.msk [vmem:[%s1294_s18 + $0x100] sm:$0xff] %vm241_vm0, %v643_v58  ;;  %877 = vst.msk [vmem:[%s1294_s18 + $0x110] sm:$0xff] %vm241_vm0, %v643_v58  ;;  %v630_v63 = vsel %vm566_vm5, %v420_v49, %v598_v55  ;;  %v430_v1 = vadd.f32 %v946_v61, %v1284_v34  ;;  %vm565_vm7 = vcmp.gt.f32.partialorder %v415_v59, 0.0  ;;  %v597_v3 = vmul.f32 0.1, %v415_v59 }
  0xe4   : > { %v646_v0 = vsel %vm582_vm6, %v500_v50, %v614_v56  ;;  %v510_v2 = vadd.f32 %v970_v62, %v1284_v34  ;;  %662 = vst.msk [vmem:[%s1294_s18 + $0x28] sm:$0xff] %vm241_vm0, %v630_v63  ;;  %864 = vst.msk [vmem:[%s1294_s18 + $0x38] sm:$0xff] %vm241_vm0, %v630_v63  ;;  %vm581_vm8 = vcmp.gt.f32.partialorder %v495_v60, 0.0  ;;  %v613_v4 = vmul.f32 0.1, %v495_v60  ;;  %v424_v5 = vpop.f32.mrf.mxu0 }
  0xe5   : > { %678 = vst.msk [vmem:[%s1294_s18 + $0x128] sm:$0xff] %vm241_vm0, %v646_v0  ;;  %880 = vst.msk [vmem:[%s1294_s18 + $0x138] sm:$0xff] %vm241_vm0, %v646_v0  ;;  %v504_v6 = vpop.f32.mrf.mxu1  ;;  %vm568_vm9 = vcmp.gt.f32.partialorder %v430_v1, 0.0  ;;  %v600_v7 = vmul.f32 0.1, %v430_v1  ;;  %v629_v9 = vsel %vm565_vm7, %v415_v59, %v597_v3  ;;  %v425_v11 = vadd.f32 %v1284_v34, %v424_v5 }
  0xe6   : > { %vm584_vm10 = vcmp.gt.f32.partialorder %v510_v2, 0.0  ;;  %v616_v8 = vmul.f32 0.1, %v510_v2  ;;  %v645_v10 = vsel %vm581_vm8, %v495_v60, %v613_v4  ;;  %v505_v12 = vadd.f32 %v1284_v34, %v504_v6  ;;  %v949_v13 = vpop.f32.mrf.mxu0  ;;  %661 = vst.msk [vmem:[%s1294_s18 + $0x20] sm:$0xff] %vm241_vm0, %v629_v9  ;;  %863 = vst.msk [vmem:[%s1294_s18 + $0x30] sm:$0xff] %vm241_vm0, %v629_v9 }
  0xe7   : > { %v973_v14 = vpop.f32.mrf.mxu1  ;;  %677 = vst.msk [vmem:[%s1294_s18 + $0x120] sm:$0xff] %vm241_vm0, %v645_v10  ;;  %879 = vst.msk [vmem:[%s1294_s18 + $0x130] sm:$0xff] %vm241_vm0, %v645_v10  ;;  %v632_v15 = vsel %vm568_vm9, %v430_v1, %v600_v7  ;;  %v440_v17 = vadd.f32 %v949_v13, %v1284_v34  ;;  %vm567_vm11 = vcmp.gt.f32.partialorder %v425_v11, 0.0  ;;  %v599_v19 = vmul.f32 0.1, %v425_v11 }
  0xe8   : > { %v648_v16 = vsel %vm584_vm10, %v510_v2, %v616_v8  ;;  %v520_v18 = vadd.f32 %v973_v14, %v1284_v34  ;;  %664 = vst.msk [vmem:[%s1294_s18 + $0x48] sm:$0xff] %vm241_vm0, %v632_v15  ;;  %866 = vst.msk [vmem:[%s1294_s18 + $0x58] sm:$0xff] %vm241_vm0, %v632_v15  ;;  %vm583_vm12 = vcmp.gt.f32.partialorder %v505_v12, 0.0  ;;  %v615_v20 = vmul.f32 0.1, %v505_v12  ;;  %v434_v21 = vpop.f32.mrf.mxu0 }
  0xe9   : > { %680 = vst.msk [vmem:[%s1294_s18 + $0x148] sm:$0xff] %vm241_vm0, %v648_v16  ;;  %882 = vst.msk [vmem:[%s1294_s18 + $0x158] sm:$0xff] %vm241_vm0, %v648_v16  ;;  %v514_v22 = vpop.f32.mrf.mxu1  ;;  %vm570_vm13 = vcmp.gt.f32.partialorder %v440_v17, 0.0  ;;  %v602_v23 = vmul.f32 0.1, %v440_v17  ;;  %v631_v25 = vsel %vm567_vm11, %v425_v11, %v599_v19  ;;  %v435_v27 = vadd.f32 %v1284_v34, %v434_v21 }
  0xea   : > { %vm586_vm14 = vcmp.gt.f32.partialorder %v520_v18, 0.0  ;;  %v618_v24 = vmul.f32 0.1, %v520_v18  ;;  %v647_v26 = vsel %vm583_vm12, %v505_v12, %v615_v20  ;;  %v515_v28 = vadd.f32 %v1284_v34, %v514_v22  ;;  %v952_v29 = vpop.f32.mrf.mxu0  ;;  %663 = vst.msk [vmem:[%s1294_s18 + $0x40] sm:$0xff] %vm241_vm0, %v631_v25  ;;  %865 = vst.msk [vmem:[%s1294_s18 + $0x50] sm:$0xff] %vm241_vm0, %v631_v25 }
  0xeb   : > { %v976_v30 = vpop.f32.mrf.mxu1  ;;  %679 = vst.msk [vmem:[%s1294_s18 + $0x140] sm:$0xff] %vm241_vm0, %v647_v26  ;;  %881 = vst.msk [vmem:[%s1294_s18 + $0x150] sm:$0xff] %vm241_vm0, %v647_v26  ;;  %v634_v31 = vsel %vm570_vm13, %v440_v17, %v602_v23  ;;  %v450_v33 = vadd.f32 %v952_v29, %v1284_v34  ;;  %vm569_vm15 = vcmp.gt.f32.partialorder %v435_v27, 0.0  ;;  %v601_v36 = vmul.f32 0.1, %v435_v27 }
  0xec   : > { %v650_v32 = vsel %vm586_vm14, %v520_v18, %v618_v24  ;;  %v530_v35 = vadd.f32 %v976_v30, %v1284_v34  ;;  %666 = vst.msk [vmem:[%s1294_s18 + $0x68] sm:$0xff] %vm241_vm0, %v634_v31  ;;  %868 = vst.msk [vmem:[%s1294_s18 + $0x78] sm:$0xff] %vm241_vm0, %v634_v31  ;;  %vm585_vm1 = vcmp.gt.f32.partialorder %v515_v28, 0.0  ;;  %v617_v37 = vmul.f32 0.1, %v515_v28  ;;  %v444_v38 = vpop.f32.mrf.mxu0 }
  0xed   : > { %682 = vst.msk [vmem:[%s1294_s18 + $0x168] sm:$0xff] %vm241_vm0, %v650_v32  ;;  %884 = vst.msk [vmem:[%s1294_s18 + $0x178] sm:$0xff] %vm241_vm0, %v650_v32  ;;  %v524_v39 = vpop.f32.mrf.mxu1  ;;  %vm572_vm2 = vcmp.gt.f32.partialorder %v450_v33, 0.0  ;;  %v604_v40 = vmul.f32 0.1, %v450_v33  ;;  %v633_v42 = vsel %vm569_vm15, %v435_v27, %v601_v36  ;;  %v445_v44 = vadd.f32 %v1284_v34, %v444_v38 }
  0xee   : > { %vm588_vm3 = vcmp.gt.f32.partialorder %v530_v35, 0.0  ;;  %v620_v41 = vmul.f32 0.1, %v530_v35  ;;  %v649_v43 = vsel %vm585_vm1, %v515_v28, %v617_v37  ;;  %v525_v45 = vadd.f32 %v1284_v34, %v524_v39  ;;  %v955_v46 = vpop.f32.mrf.mxu0  ;;  %665 = vst.msk [vmem:[%s1294_s18 + $0x60] sm:$0xff] %vm241_vm0, %v633_v42  ;;  %867 = vst.msk [vmem:[%s1294_s18 + $0x70] sm:$0xff] %vm241_vm0, %v633_v42 }
  0xef   : > { %v979_v47 = vpop.f32.mrf.mxu1  ;;  %681 = vst.msk [vmem:[%s1294_s18 + $0x160] sm:$0xff] %vm241_vm0, %v649_v43  ;;  %883 = vst.msk [vmem:[%s1294_s18 + $0x170] sm:$0xff] %vm241_vm0, %v649_v43  ;;  %v636_v48 = vsel %vm572_vm2, %v450_v33, %v604_v40  ;;  %v460_v50 = vadd.f32 %v955_v46, %v1284_v34  ;;  %vm571_vm4 = vcmp.gt.f32.partialorder %v445_v44, 0.0  ;;  %v603_v52 = vmul.f32 0.1, %v445_v44 }
  0xf0   : > { %v652_v49 = vsel %vm588_vm3, %v530_v35, %v620_v41  ;;  %v540_v51 = vadd.f32 %v979_v47, %v1284_v34  ;;  %668 = vst.msk [vmem:[%s1294_s18 + $0x88] sm:$0xff] %vm241_vm0, %v636_v48  ;;  %870 = vst.msk [vmem:[%s1294_s18 + $0x98] sm:$0xff] %vm241_vm0, %v636_v48  ;;  %vm587_vm5 = vcmp.gt.f32.partialorder %v525_v45, 0.0  ;;  %v619_v53 = vmul.f32 0.1, %v525_v45  ;;  %v454_v54 = vpop.f32.mrf.mxu0 }
  0xf1   : > { %684 = vst.msk [vmem:[%s1294_s18 + $0x188] sm:$0xff] %vm241_vm0, %v652_v49  ;;  %886 = vst.msk [vmem:[%s1294_s18 + $0x198] sm:$0xff] %vm241_vm0, %v652_v49  ;;  %v534_v55 = vpop.f32.mrf.mxu1  ;;  %vm574_vm6 = vcmp.gt.f32.partialorder %v460_v50, 0.0  ;;  %v606_v56 = vmul.f32 0.1, %v460_v50  ;;  %v635_v58 = vsel %vm571_vm4, %v445_v44, %v603_v52  ;;  %v455_v60 = vadd.f32 %v1284_v34, %v454_v54 }
  0xf2   : > { %vm590_vm7 = vcmp.gt.f32.partialorder %v540_v51, 0.0  ;;  %v622_v57 = vmul.f32 0.1, %v540_v51  ;;  %v651_v59 = vsel %vm587_vm5, %v525_v45, %v619_v53  ;;  %v535_v61 = vadd.f32 %v1284_v34, %v534_v55  ;;  %v958_v62 = vpop.f32.mrf.mxu0  ;;  %667 = vst.msk [vmem:[%s1294_s18 + $0x80] sm:$0xff] %vm241_vm0, %v635_v58  ;;  %869 = vst.msk [vmem:[%s1294_s18 + $0x90] sm:$0xff] %vm241_vm0, %v635_v58 }
  0xf3   : > { %v982_v63 = vpop.f32.mrf.mxu1  ;;  %683 = vst.msk [vmem:[%s1294_s18 + $0x180] sm:$0xff] %vm241_vm0, %v651_v59  ;;  %885 = vst.msk [vmem:[%s1294_s18 + $0x190] sm:$0xff] %vm241_vm0, %v651_v59  ;;  %v638_v0 = vsel %vm574_vm6, %v460_v50, %v606_v56  ;;  %v470_v2 = vadd.f32 %v958_v62, %v1284_v34  ;;  %vm573_vm8 = vcmp.gt.f32.partialorder %v455_v60, 0.0  ;;  %v605_v4 = vmul.f32 0.1, %v455_v60 }
  0xf4   : > { %v654_v1 = vsel %vm590_vm7, %v540_v51, %v622_v57  ;;  %v550_v3 = vadd.f32 %v982_v63, %v1284_v34  ;;  %670 = vst.msk [vmem:[%s1294_s18 + $0xa8] sm:$0xff] %vm241_vm0, %v638_v0  ;;  %872 = vst.msk [vmem:[%s1294_s18 + $0xb8] sm:$0xff] %vm241_vm0, %v638_v0  ;;  %vm589_vm9 = vcmp.gt.f32.partialorder %v535_v61, 0.0  ;;  %v621_v5 = vmul.f32 0.1, %v535_v61  ;;  %v464_v6 = vpop.f32.mrf.mxu0 }
  0xf5   : > { %686 = vst.msk [vmem:[%s1294_s18 + $0x1a8] sm:$0xff] %vm241_vm0, %v654_v1  ;;  %888 = vst.msk [vmem:[%s1294_s18 + $0x1b8] sm:$0xff] %vm241_vm0, %v654_v1  ;;  %v544_v7 = vpop.f32.mrf.mxu1  ;;  %vm576_vm10 = vcmp.gt.f32.partialorder %v470_v2, 0.0  ;;  %v608_v8 = vmul.f32 0.1, %v470_v2  ;;  %v637_v10 = vsel %vm573_vm8, %v455_v60, %v605_v4  ;;  %v465_v12 = vadd.f32 %v1284_v34, %v464_v6 }
  0xf6   : > { %vm592_vm11 = vcmp.gt.f32.partialorder %v550_v3, 0.0  ;;  %v624_v9 = vmul.f32 0.1, %v550_v3  ;;  %v653_v11 = vsel %vm589_vm9, %v535_v61, %v621_v5  ;;  %v545_v13 = vadd.f32 %v1284_v34, %v544_v7  ;;  %v961_v14 = vpop.f32.mrf.mxu0  ;;  %669 = vst.msk [vmem:[%s1294_s18 + $0xa0] sm:$0xff] %vm241_vm0, %v637_v10  ;;  %871 = vst.msk [vmem:[%s1294_s18 + $0xb0] sm:$0xff] %vm241_vm0, %v637_v10 }
  0xf7   : > { %v985_v15 = vpop.f32.mrf.mxu1  ;;  %685 = vst.msk [vmem:[%s1294_s18 + $0x1a0] sm:$0xff] %vm241_vm0, %v653_v11  ;;  %887 = vst.msk [vmem:[%s1294_s18 + $0x1b0] sm:$0xff] %vm241_vm0, %v653_v11  ;;  %v640_v16 = vsel %vm576_vm10, %v470_v2, %v608_v8  ;;  %v480_v18 = vadd.f32 %v961_v14, %v1284_v34  ;;  %vm575_vm12 = vcmp.gt.f32.partialorder %v465_v12, 0.0  ;;  %v607_v20 = vmul.f32 0.1, %v465_v12 }
  0xf8   : > { %v656_v17 = vsel %vm592_vm11, %v550_v3, %v624_v9  ;;  %v560_v19 = vadd.f32 %v985_v15, %v1284_v34  ;;  %672 = vst.msk [vmem:[%s1294_s18 + $0xc8] sm:$0xff] %vm241_vm0, %v640_v16  ;;  %874 = vst.msk [vmem:[%s1294_s18 + $0xd8] sm:$0xff] %vm241_vm0, %v640_v16  ;;  %vm591_vm13 = vcmp.gt.f32.partialorder %v545_v13, 0.0  ;;  %v623_v21 = vmul.f32 0.1, %v545_v13  ;;  %v474_v22 = vpop.f32.mrf.mxu0 }
  0xf9   : > { %688 = vst.msk [vmem:[%s1294_s18 + $0x1c8] sm:$0xff] %vm241_vm0, %v656_v17  ;;  %890 = vst.msk [vmem:[%s1294_s18 + $0x1d8] sm:$0xff] %vm241_vm0, %v656_v17  ;;  %v554_v23 = vpop.f32.mrf.mxu1  ;;  %vm578_vm14 = vcmp.gt.f32.partialorder %v480_v18, 0.0  ;;  %v610_v24 = vmul.f32 0.1, %v480_v18  ;;  %v639_v26 = vsel %vm575_vm12, %v465_v12, %v607_v20  ;;  %v475_v28 = vadd.f32 %v1284_v34, %v474_v22 }
  0xfa   : > { %vm594_vm15 = vcmp.gt.f32.partialorder %v560_v19, 0.0  ;;  %v626_v25 = vmul.f32 0.1, %v560_v19  ;;  %v655_v27 = vsel %vm591_vm13, %v545_v13, %v623_v21  ;;  %v555_v29 = vadd.f32 %v1284_v34, %v554_v23  ;;  %671 = vst.msk [vmem:[%s1294_s18 + $0xc0] sm:$0xff] %vm241_vm0, %v639_v26  ;;  %873 = vst.msk [vmem:[%s1294_s18 + $0xd0] sm:$0xff] %vm241_vm0, %v639_v26 }
  0xfb   : > { %687 = vst.msk [vmem:[%s1294_s18 + $0x1c0] sm:$0xff] %vm241_vm0, %v655_v27  ;;  %889 = vst.msk [vmem:[%s1294_s18 + $0x1d0] sm:$0xff] %vm241_vm0, %v655_v27  ;;  %v642_v30 = vsel %vm578_vm14, %v480_v18, %v610_v24  ;;  %vm577_vm1 = vcmp.gt.f32.partialorder %v475_v28, 0.0  ;;  %v609_v34 = vmul.f32 0.1, %v475_v28 }
  0xfc   : > { %v658_v31 = vsel %vm594_vm15, %v560_v19, %v626_v25  ;;  %674 = vst.msk [vmem:[%s1294_s18 + $0xe8] sm:$0xff] %vm241_vm0, %v642_v30  ;;  %876 = vst.msk [vmem:[%s1294_s18 + $0xf8] sm:$0xff] %vm241_vm0, %v642_v30  ;;  %vm593_vm2 = vcmp.gt.f32.partialorder %v555_v29, 0.0  ;;  %v625_v32 = vmul.f32 0.1, %v555_v29 }
  0xfd   : > { %690 = vst.msk [vmem:[%s1294_s18 + $0x1e8] sm:$0xff] %vm241_vm0, %v658_v31  ;;  %892 = vst.msk [vmem:[%s1294_s18 + $0x1f8] sm:$0xff] %vm241_vm0, %v658_v31  ;;  %v641_v33 = vsel %vm577_vm1, %v475_v28, %v609_v34 }
  0xfe   : > { %v657_v35 = vsel %vm593_vm2, %v555_v29, %v625_v32  ;;  %673 = vst.msk [vmem:[%s1294_s18 + $0xe0] sm:$0xff] %vm241_vm0, %v641_v33  ;;  %875 = vst.msk [vmem:[%s1294_s18 + $0xf0] sm:$0xff] %vm241_vm0, %v641_v33 }
  0xff   : > { %689 = vst.msk [vmem:[%s1294_s18 + $0x1e0] sm:$0xff] %vm241_vm0, %v657_v35  ;;  %891 = vst.msk [vmem:[%s1294_s18 + $0x1f0] sm:$0xff] %vm241_vm0, %v657_v35 }
 0x100   : > { %1060 = shalt.err (!%p1057_p5)
}
 0x101   : > { %s1061_s5 = scalar_lea.hbm %s1449_s27, 8192  ;;  %s1065_s8 = scalar_lea.hbm %s1513_s3, 16384 }
 0x102   : > { %p1062_p6 = scmp.ne.s32.totalorder %s1449_s27, %s1061_s5  ;;  %p1066_p10 = scmp.lt.s32.totalorder %s1449_s27, %s1513_s3 }
 0x103   : > { %p1067_p11 = scmp.lt.s32.totalorder %s1065_s8, %s1061_s5 }
 0x104   : > { %p1063_p7 = pnand %p1062_p6, %p1188_p4 }
 0x105   : > { %p1068_p12 = por %p1067_p11, %p1066_p10 }
 0x106   : > { %p1064_p9 = pneg %p1063_p7 }
 0x108   : > { %p1069_p13 = pnand %p1068_p12, %p1064_p9 }
 0x10a   : > { %1072 = shalt.err (!%p1069_p13)
}
 0x10b   : > { %s1126_s11 = smov 128   ;;  %s1127_s18 = smov 8  }
 0x10c   : > { %990 = dma.vmem_to_hbm [thread:$0]  (%p1188_p4), %s1453_s21, 8192, %s1449_s27, %s1465_s15, %s1126_s11, %s1126_s11, %s1127_s18  }
 0x10d PF: > { %p996_p0 = scmp.ge.s32.totalorder %s1123_s17, 2  ;;  %s756_s19 = sand.u32 1, %s1103_s12  }
 0x10e   : > { %s757_s23 = scalar_lea.sflag [#allocation3], %s756_s19 }
 0x10f   : > { %p993_p1 = pnand %p996_p0, %p1195_p8 }
 0x111   : > { %p994_p2 = pneg %p993_p1 }
 0x113   : > { %1098 = dma.done.wait (%p994_p2), %s757_s23, 8192  }
 0x114   : > { %1100 = vsyncadd (%p994_p2), %s757_s23, 4294959104  ;;  %s16_s17 = sadd.s32 1, %s1123_s17   ;;  %s1516_s12 = smov %s1107_s13 }
 0x115   : > { %p13_p3 = scmp.ge.s32.totalorder %s16_s17, 4   ;;  %s1517_s13 = smov %s1111_s14 }
 0x116   : > { %s1518_s14 = smov %s1201_s25  ;;  %s1519_s15 = smov %s1119_s16 }
 0x117   : > { %s1520_s16 = smov %s1522_s20  ;;  %15 = sbr.rel (!%p13_p3) target bundleno = 4 (0x4), region = 68 }
 0x11c   :  { %762 = vsyncpa [#allocation3], 1 }
 0x11d   :  { %764 = vsyncpa [#allocation3 + $0x1], 1 }

</bundles_post_ra>
